<compile_context>
chip_gen: v5e
topology: v5e:2x2
jax: 0.10.0
libtpu: 0.0.40
codegen_flags: <defaults>
</compile_context>

<pallas_src>
import jax
import jax.numpy as jnp
import numpy as np
from jax.experimental import pallas as pl
from jax.experimental.pallas import tpu as pltpu


def _device_kind():
    try:
        return jax.devices()[0].device_kind.lower()
    except Exception:
        return ""


def _default_use_int8_mxu(kind):
    # int8 x int8 -> int32 MXU exists on v5e/v5p/v6e; v7x MXU is bf16/fp8 only.
    return ("v5" in kind) or ("v6" in kind)


def _default_tiles(kind):
    if "v7" in kind:
        return 128, 256          # 64 MiB VMEM/TC: smaller row tile, leave headroom
    if ("v6" in kind) or ("v5" in kind):
        return 256, 512          # 128 MiB VMEM: bigger tiles cut weight restreams
    return 256, 256


def _vmem_limit_bytes(fraction=0.65, fallback=64 * 1024 * 1024):
    """~40 MiB on v7x (64 MiB VMEM), ~83 MiB on v5e/v6e (128 MiB)."""
    try:
        info = pltpu.get_tpu_info()
        cap = getattr(info, "vmem_capacity_bytes", None)
        if cap:
            return int(cap * fraction)
    except Exception:
        pass
    return fallback


def _weight_spec(K, tn, buffers):
    index_map = lambda i, j: (0, j)
    if buffers and buffers > 2:
        # v5e tuning knob: 3-deep weight-tile buffering if the j-axis DMA is exposed.
        try:
            return pl.BlockSpec((K, tn), index_map, pipeline_mode=pl.Buffered(int(buffers)))
        except Exception:
            pass
    return pl.BlockSpec((K, tn), index_map)


def _make_kernel(use_int8_mxu: bool):
    code_dtype = jnp.int8 if use_int8_mxu else jnp.bfloat16

    def kernel(x_ref, t_ref, wq_ref, wmax_ref, xunq_ref, wunq_ref, bias_ref,
               o_ref, xq_scr, xmax_scr):
        # ---- activation quantization: once per row tile (hoisted off the j axis) ----
        @pl.when(pl.program_id(1) == 0)
        def _():
            x = x_ref[...].astype(jnp.float32)                     # (TM, K)
            xq_f = x * t_ref[...]                                   # outlier cols -> 0
            x_max = jnp.max(jnp.abs(xq_f), axis=-1, keepdims=True) / 127.0
            # PyTorch would produce NaN on an all-zero row (0/0); floor instead.
            x_max = jnp.maximum(x_max, jnp.float32(1e-30))
            inv = 1.0 / x_max                                       # (TM,1) exact reciprocals
            codes = (xq_f * inv).astype(jnp.int8)                   # trunc-toward-zero
            xq_scr[...] = codes.astype(code_dtype)                  # MXU input dtype
            xmax_scr[...] = x_max

        # ---- quantized matmul + rank-1 rescale ----
        if use_int8_mxu:
            # v5e/v6e: native int8 operands, int32 accumulation (exact MatMulInteger).
            res_q = jnp.dot(xq_scr[...], wq_ref[...],
                            preferred_element_type=jnp.int32).astype(jnp.float32)
        else:
            # v7x & others: bf16 operands (exact for |code| <= 127), f32 accumulation.
            res_q = jnp.dot(xq_scr[...], wq_ref[...].astype(jnp.bfloat16),
                            preferred_element_type=jnp.float32)
        res_q = (res_q * xmax_scr[...]) * wmax_ref[...]             # (TM,1), (1,TN) broadcasts

        # ---- unquantized outlier path + bias (alpha zero-padded to 128 lanes) ----
        res_unq = jnp.dot(xunq_ref[...].astype(wunq_ref.dtype), wunq_ref[...],
                          preferred_element_type=jnp.float32)
        o_ref[...] = (res_q + res_unq + bias_ref[...]).astype(o_ref.dtype)

    return kernel


def init_w8sd_params(origin_weight, bias=None, act_max=None, alpha=32, lane=128,
                     unq_dtype=None):
    """Deterministic re-implementation of W8SDLinear.__init__ (plain JAX glue)."""
    if unq_dtype is None:
        kind = _device_kind()
        # bf16 outlier path on bf16-native MXUs (v6e/v7x); f32 elsewhere.
        unq_dtype = jnp.bfloat16 if ("v6" in kind or "v7" in kind) else jnp.float32

    N, K = origin_weight.shape
    w = origin_weight.astype(jnp.float32)
    ref_mat = w if act_max is None else act_max.astype(jnp.float32)
    col_max = jnp.max(jnp.abs(ref_mat.reshape(-1, ref_mat.shape[-1])), axis=0)   # (K,)
    idx_unq = jax.lax.top_k(col_max, alpha)[1]                                   # (alpha,)
    t = jnp.ones((K,), jnp.float32).at[idx_unq].set(0.0)

    w_q_f = w * t[None, :]                                     # outlier cols zeroed
    w_unq = w[:, idx_unq]                                      # (N, alpha)
    w_max = jnp.max(jnp.abs(w_q_f), axis=-1) / 127.0           # (N,)
    w_q8 = (w_q_f / w_max[:, None]).astype(jnp.int8)           # (N, K)

    # Pad the outlier path to a lane-friendly width: padded gather indices hit
    # column 0 whose corresponding weight rows are zero -> no mask needed.
    alpha_pad = max(lane, ((alpha + lane - 1) // lane) * lane)
    idx_pad = jnp.zeros((alpha_pad,), jnp.int32).at[:alpha].set(idx_unq.astype(jnp.int32))
    w_unq_pad = (jnp.zeros((alpha_pad, N), jnp.float32)
                 .at[:alpha, :].set(w_unq.T)).astype(unq_dtype)

    return dict(
        t=t.reshape(1, K),                                     # (1, K) f32
        weight_q=w_q8.T,                                       # (K, N) int8 (stays int8 in HBM)
        w_max=w_max.reshape(1, N),                             # (1, N) f32
        idx_unq=idx_unq,
        idx_unq_pad=idx_pad,                                   # (alpha_pad,) int32
        weight_unq=w_unq_pad,                                  # (alpha_pad, N), padded rows 0
        bias=(jnp.zeros((1, N), jnp.float32) if bias is None
              else bias.reshape(1, N).astype(jnp.float32)),
    )


def w8sd_linear(x, params, *, tm=None, tn=None, use_int8_mxu=None,
                weight_buffers=2, vmem_limit_bytes=None):
    kind = _device_kind()
    if use_int8_mxu is None:
        use_int8_mxu = _default_use_int8_mxu(kind)
    d_tm, d_tn = _default_tiles(kind)
    tm = d_tm if tm is None else tm
    tn = d_tn if tn is None else tn
    if vmem_limit_bytes is None:
        vmem_limit_bytes = _vmem_limit_bytes()

    lead = x.shape[:-1]
    K = x.shape[-1]
    Kw, N = params["weight_q"].shape
    assert K == Kw
    alpha_pad = params["weight_unq"].shape[0]

    # Activations stay in their original dtype; up-cast happens on-chip.
    x2d = x.reshape(-1, K)
    M = x2d.shape[0]
    tm = min(tm, M)
    tn = min(tn, N)
    assert M % tm == 0 and (tm % 8 == 0 or tm == M), "row tile must respect (8,128) tiling"
    assert N % tn == 0 and (tn % 128 == 0 or tn == N), "N tile must respect (8,128) tiling"

    # Outlier-column gather: tiny & data-dependent -> plain-JAX glue outside the kernel.
    x_unq = jnp.take(x2d, params["idx_unq_pad"], axis=1)       # (M, alpha_pad)

    grid = (M // tm, N // tn)
    kernel = _make_kernel(use_int8_mxu)
    code_dtype = jnp.int8 if use_int8_mxu else jnp.bfloat16

    out = pl.pallas_call(
        kernel,
        out_shape=jax.ShapeDtypeStruct((M, N), x.dtype),
        grid_spec=pltpu.PrefetchScalarGridSpec(
            num_scalar_prefetch=0,
            grid=grid,
            in_specs=[
                pl.BlockSpec((tm, K), lambda i, j: (i, 0)),            # x rows (reused across j)
                pl.BlockSpec((1, K), lambda i, j: (0, 0)),             # t mask
                _weight_spec(K, tn, weight_buffers),                   # weight_q (int8)
                pl.BlockSpec((1, tn), lambda i, j: (0, j)),            # w_max
                pl.BlockSpec((tm, alpha_pad), lambda i, j: (i, 0)),    # x_unq
                pl.BlockSpec((alpha_pad, tn), lambda i, j: (0, j)),    # weight_unq
                pl.BlockSpec((1, tn), lambda i, j: (0, j)),            # bias
            ],
            out_specs=pl.BlockSpec((tm, tn), lambda i, j: (i, j)),
            scratch_shapes=[
                pltpu.VMEM((tm, K), code_dtype),       # cached quantized activation codes
                pltpu.VMEM((tm, 1), jnp.float32),      # cached per-row x_max
            ],
        ),
        compiler_params=pltpu.CompilerParams(
            # j must iterate sequentially per row tile so the j==0 cache fill holds;
            # i remains megacore-shardable.
            dimension_semantics=("parallel", "arbitrary"),
            vmem_limit_bytes=int(vmem_limit_bytes)),
    )(x2d, params["t"], params["weight_q"], params["w_max"],
      x_unq, params["weight_unq"], params["bias"])
    return out.reshape(*lead, N)


def w8sd_linear_ref(x, params):
    """Pure-JAX reference mirroring the kernel (and the PyTorch forward up to the
    documented reciprocal / NaN-floor deviations)."""
    lead = x.shape[:-1]
    K = x.shape[-1]
    N = params["weight_q"].shape[1]
    x2d = x.reshape(-1, K).astype(jnp.float32)
    xq_f = x2d * params["t"]
    x_max = jnp.max(jnp.abs(xq_f), axis=-1, keepdims=True) / 127.0
    x_max = jnp.maximum(x_max, 1e-30)
    xq = (xq_f * (1.0 / x_max)).astype(jnp.int8).astype(jnp.float32)
    res_q = (xq @ params["weight_q"].astype(jnp.float32)) * (x_max * params["w_max"])
    unq_dt = params["weight_unq"].dtype
    x_unq = x2d[:, params["idx_unq_pad"]].astype(unq_dt)
    res_unq = jnp.dot(x_unq, params["weight_unq"],
                      preferred_element_type=jnp.float32) + params["bias"]
    return (res_q + res_unq).reshape(*lead, N).astype(x.dtype)


if __name__ == "__main__":
    key = jax.random.PRNGKey(0)
    B, S, K, N, alpha = 2, 8, 256, 256, 32
    kx, kw, kb = jax.random.split(key, 3)
    x = jax.random.normal(kx, (B, S, K), dtype=jnp.float32)
    W = jax.random.normal(kw, (N, K), dtype=jnp.float32)      # origin_weight (out, in)
    b = jax.random.normal(kb, (N,), dtype=jnp.float32)

    params = init_w8sd_params(W, bias=b, alpha=alpha)
    out = jax.block_until_ready(w8sd_linear(x, params))

    ref = w8sd_linear_ref(x, params)
    assert out.shape == (B, S, N)
    np.testing.assert_allclose(np.asarray(out), np.asarray(ref), rtol=1e-2, atol=1e-2)
    print("KERNEL_OK")
</pallas_src>

<mosaic_0001>
module attributes {stable_mosaic.version = 11 : i64} {
  func.func @kernel(%arg0: i32, %arg1: i32, %arg2: memref<16x256xf32, #tpu.memory_space<vmem>>, %arg3: memref<1x256xf32, #tpu.memory_space<vmem>>, %arg4: memref<256x256xi8, #tpu.memory_space<vmem>>, %arg5: memref<1x256xf32, #tpu.memory_space<vmem>>, %arg6: memref<16x128xf32, #tpu.memory_space<vmem>>, %arg7: memref<128x256xf32, #tpu.memory_space<vmem>>, %arg8: memref<1x256xf32, #tpu.memory_space<vmem>>, %arg9: memref<16x256xf32, #tpu.memory_space<vmem>>, %arg10: memref<16x256xbf16, #tpu.memory_space<vmem>>, %arg11: memref<16x1xf32, #tpu.memory_space<vmem>>) attributes {dimension_semantics = [#tpu.dimension_semantics<parallel>, #tpu.dimension_semantics<arbitrary>], iteration_bounds = array<i64: 1, 1>, scalar_prefetch = 0 : i64, scratch_operands = 2 : i64, tpu.core_type = #tpu.core_type<tc>, window_params = [{transform_indices = @transform_0, window_bounds = array<i64: 16, 256>}, {pipeline_mode = #tpu.pipeline_mode<synchronous>, transform_indices = @transform_1, window_bounds = array<i64: 1, 256>}, {transform_indices = @transform_2, window_bounds = array<i64: 256, 256>}, {transform_indices = @transform_3, window_bounds = array<i64: 1, 256>}, {transform_indices = @transform_4, window_bounds = array<i64: 16, 128>}, {transform_indices = @transform_5, window_bounds = array<i64: 128, 256>}, {transform_indices = @transform_6, window_bounds = array<i64: 1, 256>}, {transform_indices = @transform_7, window_bounds = array<i64: 16, 256>}]} {
    %c0_i32 = arith.constant 0 : i32
    %0 = arith.cmpi eq, %arg1, %c0_i32 : i32
    %1 = arith.extui %0 : i1 to i32
    %c0_i32_0 = arith.constant 0 : i32
    %2 = arith.cmpi ne, %1, %c0_i32_0 : i32
    scf.if %2 {
      %c0_17 = arith.constant 0 : index
      %c0_18 = arith.constant 0 : index
      %21 = vector.load %arg2[%c0_17, %c0_18] : memref<16x256xf32, #tpu.memory_space<vmem>>, vector<16x256xf32>
      %c0_19 = arith.constant 0 : index
      %c0_20 = arith.constant 0 : index
      %22 = vector.load %arg3[%c0_19, %c0_20] : memref<1x256xf32, #tpu.memory_space<vmem>>, vector<1x256xf32>
      %23 = vector.broadcast %22 : vector<1x256xf32> to vector<16x256xf32>
      %24 = arith.mulf %21, %23 : vector<16x256xf32>
      %25 = math.absf %24 : vector<16x256xf32>
      %cst_21 = arith.constant dense<0xFF800000> : vector<16xf32>
      %26 = vector.multi_reduction <maximumf>, %25, %cst_21 [1] : vector<16x256xf32> to vector<16xf32>
      %27 = vector.shape_cast %26 : vector<16xf32> to vector<16x1xf32>
      %cst_22 = arith.constant 1.270000e+02 : f32
      %28 = vector.broadcast %cst_22 : f32 to vector<16x1xf32>
      %29 = arith.divf %27, %28 : vector<16x1xf32>
      %cst_23 = arith.constant 1.000000e-30 : f32
      %30 = vector.broadcast %cst_23 : f32 to vector<16x1xf32>
      %31 = arith.maximumf %29, %30 : vector<16x1xf32>
      %cst_24 = arith.constant 1.000000e+00 : f32
      %32 = vector.broadcast %cst_24 : f32 to vector<16x1xf32>
      %33 = arith.divf %32, %31 : vector<16x1xf32>
      %34 = vector.broadcast %33 : vector<16x1xf32> to vector<16x256xf32>
      %35 = arith.mulf %24, %34 : vector<16x256xf32>
      %36 = arith.fptosi %35 : vector<16x256xf32> to vector<16x256xi8>
      %37 = arith.sitofp %36 : vector<16x256xi8> to vector<16x256xbf16>
      %c0_25 = arith.constant 0 : index
      %c0_26 = arith.constant 0 : index
      %38 = vector.load %arg10[%c0_25, %c0_26] : memref<16x256xbf16, #tpu.memory_space<vmem>>, vector<16x256xbf16>
      tpu.vector_store %arg10[%c0_25, %c0_26], %37 {strides = array<i32>} : memref<16x256xbf16, #tpu.memory_space<vmem>>, vector<16x256xbf16>,
      %c0_27 = arith.constant 0 : index
      %c0_28 = arith.constant 0 : index
      %39 = vector.load %arg11[%c0_27, %c0_28] : memref<16x1xf32, #tpu.memory_space<vmem>>, vector<16x1xf32>
      tpu.vector_store %arg11[%c0_27, %c0_28], %31 {strides = array<i32>} : memref<16x1xf32, #tpu.memory_space<vmem>>, vector<16x1xf32>,
    } else {
    }
    %c0 = arith.constant 0 : index
    %c0_1 = arith.constant 0 : index
    %3 = vector.load %arg10[%c0, %c0_1] : memref<16x256xbf16, #tpu.memory_space<vmem>>, vector<16x256xbf16>
    %c0_2 = arith.constant 0 : index
    %c0_3 = arith.constant 0 : index
    %4 = vector.load %arg4[%c0_2, %c0_3] : memref<256x256xi8, #tpu.memory_space<vmem>>, vector<256x256xi8>
    %5 = arith.sitofp %4 : vector<256x256xi8> to vector<256x256xbf16>
    %cst = arith.constant dense<0.000000e+00> : vector<16x256xf32>
    %6 = tpu.matmul %3, %5, %cst {dimension_numbers = #tpu.dot_dimension_numbers<[1], [0], [0], [1], [0, 0, 1, 1], [], []>} : vector<16x256xbf16>, vector<256x256xbf16>, vector<16x256xf32> -> vector<16x256xf32>
    %c0_4 = arith.constant 0 : index
    %c0_5 = arith.constant 0 : index
    %7 = vector.load %arg11[%c0_4, %c0_5] : memref<16x1xf32, #tpu.memory_space<vmem>>, vector<16x1xf32>
    %8 = vector.broadcast %7 : vector<16x1xf32> to vector<16x256xf32>
    %9 = arith.mulf %6, %8 : vector<16x256xf32>
    %c0_6 = arith.constant 0 : index
    %c0_7 = arith.constant 0 : index
    %10 = vector.load %arg5[%c0_6, %c0_7] : memref<1x256xf32, #tpu.memory_space<vmem>>, vector<1x256xf32>
    %11 = vector.broadcast %10 : vector<1x256xf32> to vector<16x256xf32>
    %12 = arith.mulf %9, %11 : vector<16x256xf32>
    %c0_8 = arith.constant 0 : index
    %c0_9 = arith.constant 0 : index
    %13 = vector.load %arg6[%c0_8, %c0_9] : memref<16x128xf32, #tpu.memory_space<vmem>>, vector<16x128xf32>
    %c0_10 = arith.constant 0 : index
    %c0_11 = arith.constant 0 : index
    %14 = vector.load %arg7[%c0_10, %c0_11] : memref<128x256xf32, #tpu.memory_space<vmem>>, vector<128x256xf32>
    %cst_12 = arith.constant dense<0.000000e+00> : vector<16x256xf32>
    %15 = tpu.matmul %13, %14, %cst_12 {dimension_numbers = #tpu.dot_dimension_numbers<[1], [0], [0], [1], [0, 0, 1, 1], [], []>} : vector<16x128xf32>, vector<128x256xf32>, vector<16x256xf32> -> vector<16x256xf32>
    %16 = arith.addf %12, %15 : vector<16x256xf32>
    %c0_13 = arith.constant 0 : index
    %c0_14 = arith.constant 0 : index
    %17 = vector.load %arg8[%c0_13, %c0_14] : memref<1x256xf32, #tpu.memory_space<vmem>>, vector<1x256xf32>
    %18 = vector.broadcast %17 : vector<1x256xf32> to vector<16x256xf32>
    %19 = arith.addf %16, %18 : vector<16x256xf32>
    %c0_15 = arith.constant 0 : index
    %c0_16 = arith.constant 0 : index
    %20 = vector.load %arg9[%c0_15, %c0_16] : memref<16x256xf32, #tpu.memory_space<vmem>>, vector<16x256xf32>
    tpu.vector_store %arg9[%c0_15, %c0_16], %19 {strides = array<i32>} : memref<16x256xf32, #tpu.memory_space<vmem>>, vector<16x256xf32>,
    return
  }
  func.func @transform_0(%arg0: i32, %arg1: i32) -> (i32, i32) {
    %c0_i32 = arith.constant 0 : i32
    %c0_i32_0 = arith.constant 0 : i32
    return %arg0, %c0_i32 : i32, i32
  }
  func.func @transform_1(%arg0: i32, %arg1: i32) -> (i32, i32) {
    %c0_i32 = arith.constant 0 : i32
    %c0_i32_0 = arith.constant 0 : i32
    %c0_i32_1 = arith.constant 0 : i32
    return %c0_i32, %c0_i32_0 : i32, i32
  }
  func.func @transform_2(%arg0: i32, %arg1: i32) -> (i32, i32) {
    %c0_i32 = arith.constant 0 : i32
    %c0_i32_0 = arith.constant 0 : i32
    return %c0_i32, %arg1 : i32, i32
  }
  func.func @transform_3(%arg0: i32, %arg1: i32) -> (i32, i32) {
    %c0_i32 = arith.constant 0 : i32
    %c0_i32_0 = arith.constant 0 : i32
    return %c0_i32, %arg1 : i32, i32
  }
  func.func @transform_4(%arg0: i32, %arg1: i32) -> (i32, i32) {
    %c0_i32 = arith.constant 0 : i32
    %c0_i32_0 = arith.constant 0 : i32
    return %arg0, %c0_i32 : i32, i32
  }
  func.func @transform_5(%arg0: i32, %arg1: i32) -> (i32, i32) {
    %c0_i32 = arith.constant 0 : i32
    %c0_i32_0 = arith.constant 0 : i32
    return %c0_i32, %arg1 : i32, i32
  }
  func.func @transform_6(%arg0: i32, %arg1: i32) -> (i32, i32) {
    %c0_i32 = arith.constant 0 : i32
    %c0_i32_0 = arith.constant 0 : i32
    return %c0_i32, %arg1 : i32, i32
  }
  func.func @transform_7(%arg0: i32, %arg1: i32) -> (i32, i32) {
    %c0_i32 = arith.constant 0 : i32
    return %arg0, %arg1 : i32, i32
  }
}

</mosaic_0001>

<bundles_post_ra>
// kernel: tpu_custom_call.1
= control target key start
LH: loop header
LB: loop body
LE: loop exit
PB: predicated region body
PF: predicated region fallthrough
CT: control target
= control target key end

     0   :  { %12 = vsyncpa [#allocation5], 0  ;;  %s1001_s0 = inlined_call_operand.hbm [shape: f32[16,256], index: 0, kind: input, shape index: {}]   ;;  %s1002_s1 = inlined_call_operand.hbm [shape: f32[1,256], index: 1, kind: input, shape index: {}]   ;;  %s1003_s2 = inlined_call_operand.hbm [shape: s8[256,256], index: 2, kind: input, shape index: {}]   ;;  %s1004_s3 = inlined_call_operand.vmem [shape: f32[1,256], index: 3, kind: input, shape index: {}]   ;;  %s1005_s4 = inlined_call_operand.hbm [shape: f32[16,128], index: 4, kind: input, shape index: {}]   ;;  %s1006_s5 = inlined_call_operand.hbm [shape: f32[128,256], index: 5, kind: input, shape index: {}]   ;;  %s1007_s6 = inlined_call_operand.vmem [shape: f32[1,256], index: 6, kind: input, shape index: {}]   ;;  %s1008_s7 = inlined_call_operand.hbm [shape: f32[16,256], index: 7, kind: output, shape index: {}]  }
   0x1   :  { %13 = vsyncpa [#allocation8], 0 }
   0x2   :  { %14 = vsyncpa [#allocation11], 0  ;;  %s34_s26 = sshll.u32 %s1002_s1, 4  ;;  %s35_s26 = int_to_ptr.hbm [resolvable:$true] %s34_s26 }
   0x3   :  { %15 = vsyncpa [#allocation6], 0  ;;  %s830_s27 = smov [#allocation7]   ;;  %s59_s8 = sshll.u32 %s1005_s4, 4  ;;  %s60_s8 = int_to_ptr.hbm [resolvable:$true] %s59_s8 }
   0x4   :  { %s36_s28 = sshll.u32 %s830_s27, 4  ;;  %s831_s9 = smov [#allocation10]   ;;  %s37_s28 = int_to_ptr.vmem [resolvable:$true] %s36_s28 }
   0x5   :  { %39 = dma.hbm_to_vmem [thread:$0]  %s35_s26, 32, %s37_s28, [#allocation8]  }
   0x6   :  { %s61_s10 = sshll.u32 %s831_s9, 4  ;;  %s832_s11 = smov 128   ;;  %s62_s10 = int_to_ptr.vmem [resolvable:$true] %s61_s10 }
   0x7   :  { %s833_s12 = smov 8   ;;  %s20_s1 = sshll.u32 %s1001_s0, 4  ;;  %s21_s1 = int_to_ptr.hbm [resolvable:$true] %s20_s1 }
   0x8   :  { %67 = dma.hbm_to_vmem [thread:$0]  %s60_s8, 256, %s62_s10, [#allocation11], %s832_s11, %s832_s11, %s833_s12  }
   0x9   :  { %s834_s15 = smov [#allocation4]   ;;  %s44_s4 = sshll.u32 %s1003_s2, 4  ;;  %s45_s4 = int_to_ptr.hbm [resolvable:$true] %s44_s4 }
   0xa   :  { %s22_s16 = sshll.u32 %s834_s15, 4  ;;  %s835_s19 = smov 256   ;;  %s23_s16 = int_to_ptr.vmem [resolvable:$true] %s22_s16 }
   0xb   :  { %s836_s20 = smov 16   ;;  %s837_s21 = smov [#allocation9]  }
   0xc   :  { %28 = dma.hbm_to_vmem [thread:$0]  %s21_s1, 512, %s23_s16, [#allocation5], %s835_s19, %s835_s19, %s836_s20  }
   0xd   :  { %s46_s22 = sshll.u32 %s837_s21, 4  ;;  %s72_s0 = sshll.u32 %s1006_s5, 4  ;;  %s47_s22 = int_to_ptr.vmem [resolvable:$true] %s46_s22  ;;  %s73_s0 = int_to_ptr.hbm [resolvable:$true] %s72_s0 }
   0xe   :  { %52 = dma.hbm_to_vmem [thread:$0]  %s45_s4, 2048, %s47_s22, [#allocation8], %s835_s19, %s835_s19, %s836_s20  }
   0xf   :  { %s838_s2 = smov [#allocation12]  }
  0x10   :  { %s74_s25 = sshll.u32 %s838_s2, 4  ;;  %s75_s25 = int_to_ptr.vmem [resolvable:$true] %s74_s25 }
  0x11   :  { %80 = dma.hbm_to_vmem [thread:$0]  %s73_s0, 4096, %s75_s25, [#allocation11], %s835_s19, %s835_s19, %s836_s20  }
  0x12   :  { %822 = dma.done.wait [#allocation5], 512  }
  0x13   :  { %823 = vsyncadd [#allocation5], 4294966784 }
  0x14   :  { %824 = dma.done.wait [#allocation8], 2080  }
  0x15   :  { %825 = vsyncadd [#allocation8], 4294965216 }
  0x16   :  { %826 = dma.done.wait [#allocation11], 4352  }
  0x17   :  { %827 = vsyncadd [#allocation11], 4294962944  ;;  %v107_v0 = vld [vmem:[#allocation4] sm:$0xff]  ;;  %v108_v1 = vld [vmem:[#allocation4 + $0x8] sm:$0xff]  ;;  %v839_v17 = vmov 127.0   ;;  %v840_v31 = vmov 0  }
  0x18   :  { %v111_v2 = vld [vmem:[#allocation7] sm:$0x3]  ;;  %v109_v5 = vld [vmem:[#allocation4 + $0x10] sm:$0xff]  ;;  %v110_v6 = vld [vmem:[#allocation4 + $0x18] sm:$0xff]  ;;  %672 = vrcp.f32 %v839_v17  ;;  %670 = vset.pattern.permute.xlu1 %v840_v31  ;;  %671 = vset.pattern.permute.xlu0 %v840_v31  ;;  %vm204_vm1 = vcmask 7168   ;;  %s581_s8 = sshll.u32 %s1008_s7, 4  ;;  %s582_s8 = int_to_ptr.hbm [resolvable:$true] %s581_s8 }
  0x19   :  { %v113_v3 = vperm.slane %v111_v2, 0  ;;  %v114_v4 = vperm.slane %v111_v2, 1  ;;  %v215_v24 = vld [vmem:[#allocation9 + $0x30] sm:$0xff]  ;;  %v216_v26 = vld [vmem:[#allocation9 + $0x38] sm:$0xff]  ;;  %v213_v60 = vld [vmem:[#allocation9 + $0x20] sm:$0xff] }
  0x1a   :  { %v223_v25 = vld [vmem:[#allocation9 + $0x70] sm:$0xff]  ;;  %v253_v27 = vunpack.c.2.s8 %v215_v24  ;;  %v255_v28 = vunpack.c.3.s8 %v215_v24  ;;  %v224_v30 = vld [vmem:[#allocation9 + $0x78] sm:$0xff]  ;;  %v254_v33 = vunpack.c.2.s8 %v216_v26  ;;  %v256_v34 = vunpack.c.3.s8 %v216_v26  ;;  %v221_v61 = vld [vmem:[#allocation9 + $0x60] sm:$0xff] }
  0x1b   :  { %v906_v7 = vmul.f32 %v113_v3, %v107_v0  ;;  %v908_v8 = vmul.f32 %v114_v4, %v108_v1  ;;  %v912_v11 = vmul.f32 %v113_v3, %v109_v5  ;;  %v914_v12 = vmul.f32 %v114_v4, %v110_v6  ;;  %v214_v2 = vld [vmem:[#allocation9 + $0x28] sm:$0xff] }
  0x1c   :  { %v285_v29 = vunpack.c.2.s8 %v223_v25  ;;  %v287_v32 = vunpack.c.3.s8 %v223_v25  ;;  %v286_v35 = vunpack.c.2.s8 %v224_v30  ;;  %v317_v36 = vcvt.s32.f32 %v253_v27 }
  0x1d   :  { %v121_v9 = vand.u32 2147483647, %v906_v7  ;;  %v122_v10 = vand.u32 2147483647, %v908_v8  ;;  %v123_v14 = vand.u32 2147483647, %v912_v11  ;;  %v319_v37 = vcvt.s32.f32 %v255_v28 }
  0x1e   :  { %v124_v15 = vand.u32 2147483647, %v914_v12  ;;  %v673_v18 = vpop.eup %672  ;;  %v349_v38 = vcvt.s32.f32 %v285_v29  ;;  %v288_v39 = vunpack.c.3.s8 %v224_v30  ;;  %v351_v40 = vcvt.s32.f32 %v287_v32 }
  0x1f   :  { %v125_v13 = vmax.f32 %v121_v9, %v122_v10  ;;  %v132_v19 = vmul.f32 127.0, %v673_v18  ;;  %vm136_vm0 = vweird.f32 %v673_v18  ;;  %v318_v41 = vcvt.s32.f32 %v254_v33  ;;  %v222_v9 = vld [vmem:[#allocation9 + $0x68] sm:$0xff] }
  0x20   :  { %v128_v16 = vmax.f32 %v123_v14, %v124_v15  ;;  %v320_v42 = vcvt.s32.f32 %v256_v34  ;;  %v350_v43 = vcvt.s32.f32 %v286_v35  ;;  %v367_v44 = vpack.c.bf16 %v319_v37, %v317_v36 }
  0x21   :  { %126 = vmax.xlane.f32.xlu0 %v125_v13  ;;  %v133_v20 = vsub.f32 1.0, %v132_v19  ;;  %v352_v45 = vcvt.s32.f32 %v288_v39  ;;  %v249_v46 = vunpack.c.0.s8 %v215_v24  ;;  %v251_v47 = vunpack.c.1.s8 %v215_v24 }
  0x22   :  { %v383_v48 = vpack.c.bf16 %v351_v40, %v349_v38  ;;  %v368_v49 = vpack.c.bf16 %v320_v42, %v318_v41  ;;  %v281_v50 = vunpack.c.0.s8 %v223_v25  ;;  %v283_v51 = vunpack.c.1.s8 %v223_v25  ;;  %395 = vmatpush.bf16.msra.mxu0 %v367_v44  ;;  %v211_v41 = vld [vmem:[#allocation9 + $0x10] sm:$0xff] }
  0x23   :  { %v134_v21 = vmul.f32 %v673_v18, %v133_v20  ;;  %v384_v52 = vpack.c.bf16 %v352_v45, %v350_v43  ;;  %v313_v53 = vcvt.s32.f32 %v249_v46  ;;  %v315_v54 = vcvt.s32.f32 %v251_v47  ;;  %v219_v46 = vld [vmem:[#allocation9 + $0x50] sm:$0xff] }
  0x24   :  { %v250_v55 = vunpack.c.0.s8 %v216_v26  ;;  %409 = vmatpush.bf16.msra.mxu1 %v383_v48  ;;  %423 = vmatpush.bf16.msra.mxu2 %v368_v49  ;;  %v345_v56 = vcvt.s32.f32 %v281_v50  ;;  %v347_v57 = vcvt.s32.f32 %v283_v51  ;;  %v252_v58 = vunpack.c.1.s8 %v216_v26  ;;  %v920_v51 = vld [vmem:[#allocation9 + $0x18] sm:$0xff] }
  0x25   :  { %v135_v22 = vadd.f32 %v673_v18, %v134_v21  ;;  %v282_v59 = vunpack.c.0.s8 %v224_v30  ;;  %437 = vmatpush.bf16.msra.mxu3 %v384_v52  ;;  %v365_v62 = vpack.c.bf16 %v315_v54, %v313_v53  ;;  %v284_v0 = vunpack.c.1.s8 %v224_v30 }
  0x26   :  { %v314_v63 = vcvt.s32.f32 %v250_v55  ;;  %v245_v1 = vunpack.c.2.s8 %v213_v60  ;;  %v381_v3 = vpack.c.bf16 %v347_v57, %v345_v56  ;;  %v316_v4 = vcvt.s32.f32 %v252_v58 }
  0x27   :  { %v918_v23 = vsel %vm136_vm0, %v673_v18, %v135_v22  ;;  %v346_v5 = vcvt.s32.f32 %v282_v59  ;;  %v247_v6 = vunpack.c.3.s8 %v213_v60  ;;  %396 = vmatpush.bf16.msra.mxu0 %v365_v62  ;;  %v348_v10 = vcvt.s32.f32 %v284_v0 }
  0x28   :  { %v309_v13 = vcvt.s32.f32 %v245_v1  ;;  %v277_v14 = vunpack.c.2.s8 %v221_v61  ;;  %v279_v15 = vunpack.c.3.s8 %v221_v61  ;;  %410 = vmatpush.bf16.msra.mxu1 %v381_v3  ;;  %v246_v18 = vunpack.c.2.s8 %v214_v2 }
  0x29   :  { %129 = vmax.xlane.f32.xlu0 %v128_v16  ;;  %v366_v16 = vpack.c.bf16 %v316_v4, %v314_v63  ;;  %v311_v17 = vcvt.s32.f32 %v247_v6  ;;  %v248_v19 = vunpack.c.3.s8 %v214_v2  ;;  %v382_v20 = vpack.c.bf16 %v348_v10, %v346_v5 }
  0x2a   :  { %v341_v21 = vcvt.s32.f32 %v277_v14  ;;  %v343_v22 = vcvt.s32.f32 %v279_v15  ;;  %v278_v24 = vunpack.c.2.s8 %v222_v9  ;;  %v310_v26 = vcvt.s32.f32 %v246_v18 }
  0x2b   :  { %424 = vmatpush.bf16.msra.mxu2 %v366_v16  ;;  %v363_v25 = vpack.c.bf16 %v311_v17, %v309_v13  ;;  %v312_v27 = vcvt.s32.f32 %v248_v19  ;;  %v280_v28 = vunpack.c.3.s8 %v222_v9  ;;  %438 = vmatpush.bf16.msra.mxu3 %v382_v20  ;;  %v241_v31 = vunpack.c.0.s8 %v213_v60 }
  0x2c   :  { %v379_v29 = vpack.c.bf16 %v343_v22, %v341_v21  ;;  %v342_v30 = vcvt.s32.f32 %v278_v24  ;;  %v243_v32 = vunpack.c.1.s8 %v213_v60  ;;  %v273_v35 = vunpack.c.0.s8 %v221_v61 }
  0x2d   :  { %397 = vmatpush.bf16.msra.mxu0 %v363_v25  ;;  %v364_v33 = vpack.c.bf16 %v312_v27, %v310_v26  ;;  %v344_v34 = vcvt.s32.f32 %v280_v28  ;;  %v275_v36 = vunpack.c.1.s8 %v221_v61  ;;  %v305_v37 = vcvt.s32.f32 %v241_v31  ;;  %v923_v61 = vld [vmem:[#allocation9 + $0x58] sm:$0xff] }
  0x2e   :  { %411 = vmatpush.bf16.msra.mxu1 %v379_v29  ;;  %v307_v38 = vcvt.s32.f32 %v243_v32  ;;  %v242_v39 = vunpack.c.0.s8 %v214_v2  ;;  %v244_v40 = vunpack.c.1.s8 %v214_v2  ;;  %v337_v43 = vcvt.s32.f32 %v273_v35 }
  0x2f   :  { %425 = vmatpush.bf16.msra.mxu2 %v364_v33  ;;  %v380_v42 = vpack.c.bf16 %v344_v34, %v342_v30  ;;  %v339_v44 = vcvt.s32.f32 %v275_v36  ;;  %v274_v45 = vunpack.c.0.s8 %v222_v9  ;;  %v276_v50 = vunpack.c.1.s8 %v222_v9 }
  0x30   :  { %v361_v47 = vpack.c.bf16 %v307_v38, %v305_v37  ;;  %v306_v48 = vcvt.s32.f32 %v242_v39  ;;  %v308_v49 = vcvt.s32.f32 %v244_v40  ;;  %v237_v55 = vunpack.c.2.s8 %v211_v41 }
  0x31   :  { %439 = vmatpush.bf16.msra.mxu3 %v380_v42  ;;  %v377_v53 = vpack.c.bf16 %v339_v44, %v337_v43  ;;  %v338_v54 = vcvt.s32.f32 %v274_v45  ;;  %v239_v56 = vunpack.c.3.s8 %v211_v41  ;;  %v340_v59 = vcvt.s32.f32 %v276_v50  ;;  %v943_v44 = vld [vmem:[#allocation9] sm:$0xff]  ;;  %v510_v45 = vld [vmem:[#allocation12 + $0xf8] sm:$0xff] }
  0x32   :  { %398 = vmatpush.bf16.msra.mxu0 %v361_v47  ;;  %v362_v58 = vpack.c.bf16 %v308_v49, %v306_v48  ;;  %v269_v60 = vunpack.c.2.s8 %v219_v46  ;;  %v301_v62 = vcvt.s32.f32 %v237_v55  ;;  %v271_v0 = vunpack.c.3.s8 %v219_v46  ;;  %v217_v47 = vld [vmem:[#allocation9 + $0x40] sm:$0xff] }
  0x33   :  { %412 = vmatpush.bf16.msra.mxu1 %v377_v53  ;;  %v303_v63 = vcvt.s32.f32 %v239_v56  ;;  %v238_v1 = vunpack.c.2.s8 %v920_v51  ;;  %v378_v3 = vpack.c.bf16 %v340_v59, %v338_v54  ;;  %v240_v5 = vunpack.c.3.s8 %v920_v51 }
  0x34   :  { %426 = vmatpush.bf16.msra.mxu2 %v362_v58  ;;  %v333_v4 = vcvt.s32.f32 %v269_v60  ;;  %v335_v9 = vcvt.s32.f32 %v271_v0  ;;  %v270_v13 = vunpack.c.2.s8 %v923_v61  ;;  %v272_v16 = vunpack.c.3.s8 %v923_v61  ;;  %v959_v60 = vld [vmem:[#allocation9 + $0x48] sm:$0xff] }
  0x35   :  { %v359_v6 = vpack.c.bf16 %v303_v63, %v301_v62  ;;  %v302_v10 = vcvt.s32.f32 %v238_v1  ;;  %440 = vmatpush.bf16.msra.mxu3 %v378_v3  ;;  %v304_v15 = vcvt.s32.f32 %v240_v5  ;;  %v233_v20 = vunpack.c.0.s8 %v211_v41 }
  0x36   :  { %v375_v14 = vpack.c.bf16 %v335_v9, %v333_v4  ;;  %v334_v17 = vcvt.s32.f32 %v270_v13  ;;  %v235_v21 = vunpack.c.1.s8 %v211_v41  ;;  %v336_v25 = vcvt.s32.f32 %v272_v16 }
  0x37   :  { %399 = vmatpush.bf16.msra.mxu0 %v359_v6  ;;  %v360_v24 = vpack.c.bf16 %v304_v15, %v302_v10  ;;  %v265_v26 = vunpack.c.0.s8 %v219_v46  ;;  %v267_v27 = vunpack.c.1.s8 %v219_v46  ;;  %v297_v29 = vcvt.s32.f32 %v233_v20 }
  0x38   :  { %413 = vmatpush.bf16.msra.mxu1 %v375_v14  ;;  %v299_v30 = vcvt.s32.f32 %v235_v21  ;;  %v234_v31 = vunpack.c.0.s8 %v920_v51  ;;  %v376_v32 = vpack.c.bf16 %v336_v25, %v334_v17  ;;  %v236_v35 = vunpack.c.1.s8 %v920_v51 }
  0x39   :  { %427 = vmatpush.bf16.msra.mxu2 %v360_v24  ;;  %v329_v33 = vcvt.s32.f32 %v265_v26  ;;  %v331_v34 = vcvt.s32.f32 %v267_v27  ;;  %v266_v40 = vunpack.c.0.s8 %v923_v61  ;;  %v268_v50 = vunpack.c.1.s8 %v923_v61 }
  0x3a   :  { %v357_v38 = vpack.c.bf16 %v299_v30, %v297_v29  ;;  %v298_v39 = vcvt.s32.f32 %v234_v31  ;;  %441 = vmatpush.bf16.msra.mxu3 %v376_v32  ;;  %v300_v43 = vcvt.s32.f32 %v236_v35  ;;  %v229_v54 = vunpack.c.2.s8 %v943_v44 }
  0x3b   :  { %v373_v42 = vpack.c.bf16 %v331_v34, %v329_v33  ;;  %v330_v51 = vcvt.s32.f32 %v266_v40  ;;  %v231_v55 = vunpack.c.3.s8 %v943_v44  ;;  %v261_v58 = vunpack.c.2.s8 %v217_v47 }
  0x3c   :  { %400 = vmatpush.bf16.msra.mxu0 %v357_v38  ;;  %v358_v49 = vpack.c.bf16 %v300_v43, %v298_v39  ;;  %v263_v59 = vunpack.c.3.s8 %v217_v47  ;;  %v293_v62 = vcvt.s32.f32 %v229_v54  ;;  %v262_v14 = vunpack.c.2.s8 %v959_v60 }
  0x3d   :  { %414 = vmatpush.bf16.msra.mxu1 %v373_v42  ;;  %v295_v63 = vcvt.s32.f32 %v231_v55  ;;  %v325_v4 = vcvt.s32.f32 %v261_v58  ;;  %v264_v21 = vunpack.c.3.s8 %v959_v60  ;;  %v225_v27 = vunpack.c.0.s8 %v943_v44 }
  0x3e   :  { %428 = vmatpush.bf16.msra.mxu2 %v358_v49  ;;  %v327_v5 = vcvt.s32.f32 %v263_v59  ;;  %v227_v29 = vunpack.c.1.s8 %v943_v44  ;;  %v257_v30 = vunpack.c.0.s8 %v217_v47  ;;  %v259_v31 = vunpack.c.1.s8 %v217_v47  ;;  %v509_v44 = vld [vmem:[#allocation12 + $0xf0] sm:$0xff] }
  0x3f   :  { %v355_v9 = vpack.c.bf16 %v295_v63, %v293_v62  ;;  %v289_v34 = vcvt.s32.f32 %v225_v27  ;;  %v258_v47 = vunpack.c.0.s8 %v959_v60  ;;  %v505_v62 = vld [vmem:[#allocation12 + $0xd0] sm:$0xff] }
  0x40   :  { %v321_v38 = vcvt.s32.f32 %v257_v30  ;;  %v495_v30 = vld [vmem:[#allocation12 + $0x80] sm:$0xff] }
  0x41   :  { %401 = vmatpush.bf16.msra.mxu0 %v355_v9  ;;  %v322_v63 = vcvt.s32.f32 %v258_v47  ;;  %v504_v9 = vld [vmem:[#allocation12 + $0xc8] sm:$0xff]  ;;  %v490_v47 = vld [vmem:[#allocation12 + $0x58] sm:$0xff] }
  0x94   :  { %v127_v52 = vpop.xlane.xlu0 %126 }
  0x95   :  { %v138_v57 = vmul.f32 %v918_v23, %v127_v52  ;;  %v954_v52 = vld [vmem:[#allocation9 + $0x8] sm:$0xff] }
  0x96   :  { %v230_v61 = vunpack.c.2.s8 %v954_v52  ;;  %v232_v0 = vunpack.c.3.s8 %v954_v52  ;;  %v226_v40 = vunpack.c.0.s8 %v954_v52  ;;  %v228_v43 = vunpack.c.1.s8 %v954_v52 }
  0x97   :  { %v926_v2 = vmax.f32 %v138_v57, 1e-30  ;;  %v332_v57 = vcvt.s32.f32 %v268_v50  ;;  %v507_v50 = vld [vmem:[#allocation12 + $0xe0] sm:$0xff]  ;;  %v260_v52 = vunpack.c.1.s8 %v959_v60 }
  0x98   :  { %v294_v10 = vcvt.s32.f32 %v230_v61  ;;  %v296_v13 = vcvt.s32.f32 %v232_v0  ;;  %v290_v49 = vcvt.s32.f32 %v226_v40  ;;  %v506_v0 = vld [vmem:[#allocation12 + $0xd8] sm:$0xff] }
  0x99   :  { %674 = vrcp.f32 %v926_v2  ;;  %205 = vst.msk [vmem:[#allocation3] sm:$0xff] %vm204_vm1, %v926_v2  ;;  %v151_v18 = vand.u32 2147483647, %v926_v2  ;;  %v153_v19 = vand.u32 2147483648, %v926_v2  ;;  %vm147_vm2 = vweird.f32 %v926_v2 }
  0x9a   :  { %v374_v3 = vpack.c.bf16 %v332_v57, %v330_v51  ;;  %v508_v51 = vld [vmem:[#allocation12 + $0xe8] sm:$0xff]  ;;  %v324_v61 = vcvt.s32.f32 %v260_v52 }
  0x9b   :  { %vm946_vm3 = vcmp.eq.f32.partialorder %v151_v18, 8.507059e+37  ;;  %v154_v46 = vor.u32 1.1754944e-38, %v153_v19  ;;  %v371_v19 = vpack.c.bf16 %v327_v5, %v325_v4  ;;  %v503_v4 = vld [vmem:[#allocation12 + $0xc0] sm:$0xff]  ;;  %v484_v52 = vld [vmem:[#allocation12 + $0x28] sm:$0xff] }
  0x9c   :  { %v130_v22 = vpop.xlane.xlu0 %129  ;;  %442 = vmatpush.bf16.msra.mxu3 %v374_v3 }
  0x9d   :  { %v139_v28 = vmul.f32 %v918_v23, %v130_v22  ;;  %v326_v22 = vcvt.s32.f32 %v262_v14  ;;  %415 = vmatpush.bf16.msra.mxu1 %v371_v19 }
  0x9f   :  { %v675_v36 = vpop.eup %674  ;;  %v939_v37 = vmax.f32 %v139_v28, 1e-30  ;;  %v328_v28 = vcvt.s32.f32 %v264_v21  ;;  %v500_v21 = vld [vmem:[#allocation12 + $0xa8] sm:$0xff] }
  0xa0   :  { %v143_v41 = vmul.f32 %v675_v36, %v926_v2  ;;  %v451_v23 = vld [vmem:[#allocation3] sm:$0xff]  ;;  %vm148_vm4 = vweird.f32 %v675_v36  ;;  %v356_v2 = vpack.c.bf16 %v296_v13, %v294_v10  ;;  %v501_v10 = vld [vmem:[#allocation12 + $0xb0] sm:$0xff] }
  0xa1   :  { %676 = vrcp.f32 %v939_v37  ;;  %206 = vst.msk [vmem:[#allocation3 + $0x8] sm:$0xff] %vm204_vm1, %v939_v37  ;;  %455 = vperm.xlu1 %670, %v451_v23   ;;  %v166_v53 = vand.u32 2147483647, %v939_v37  ;;  %vm149_vm5 = vmor %vm147_vm2, %vm148_vm4  ;;  %v168_v17 = vand.u32 2147483648, %v939_v37  ;;  %v372_v35 = vpack.c.bf16 %v328_v28, %v326_v22  ;;  %v497_v22 = vld [vmem:[#allocation12 + $0x90] sm:$0xff] }
  0xa2   :  { %v144_v48 = vsub.f32 1.0, %v143_v41  ;;  %429 = vmatpush.bf16.msra.mxu2 %v356_v2  ;;  %vm162_vm7 = vweird.f32 %v939_v37 }
  0xa3   :  { %443 = vmatpush.bf16.msra.mxu3 %v372_v35  ;;  %vm167_vm9 = vcmp.eq.f32.partialorder %v166_v53, 8.507059e+37 }
  0xa4   :  { %v145_v56 = vmul.f32 %v675_v36, %v144_v48 }
  0xa6   :  { %v146_v1 = vadd.f32 %v675_v36, %v145_v56  ;;  %v292_v56 = vcvt.s32.f32 %v228_v43 }
  0xa7   :  { %v677_v6 = vpop.eup %676 }
  0xa8   :  { %v150_v15 = vsel %vm149_vm5, %v675_v36, %v146_v1  ;;  %v158_v16 = vmul.f32 %v677_v6, %v939_v37  ;;  %v452_v18 = vld [vmem:[#allocation3 + $0x8] sm:$0xff]  ;;  %vm163_vm6 = vweird.f32 %v677_v6  ;;  %v291_v36 = vcvt.s32.f32 %v227_v29  ;;  %v498_v29 = vld [vmem:[#allocation12 + $0x98] sm:$0xff] }
  0xa9   :  { %v155_v20 = vsel %vm946_vm3, %v154_v46, %v150_v15  ;;  %460 = vperm.xlu1 %670, %v452_v18   ;;  %vm164_vm8 = vmor %vm162_vm7, %vm163_vm6  ;;  %v169_v46 = vor.u32 1.1754944e-38, %v168_v17  ;;  %v354_v53 = vpack.c.bf16 %v292_v56, %v290_v49  ;;  %v499_v17 = vld [vmem:[#allocation12 + $0xa0] sm:$0xff] }
  0xaa   :  { %v172_v24 = vmul.f32 %v155_v20, %v906_v7  ;;  %v173_v25 = vmul.f32 %v155_v20, %v908_v8  ;;  %v159_v26 = vsub.f32 1.0, %v158_v16  ;;  %v323_v7 = vcvt.s32.f32 %v259_v31  ;;  %v502_v16 = vld [vmem:[#allocation12 + $0xb8] sm:$0xff]  ;;  %v483_v56 = vld [vmem:[#allocation12 + $0x20] sm:$0xff] }
  0xab   :  { %v353_v23 = vpack.c.bf16 %v291_v36, %v289_v34  ;;  %430 = vmatpush.bf16.msra.mxu2 %v354_v53  ;;  %v493_v34 = vld [vmem:[#allocation12 + $0x70] sm:$0xff] }
  0xac   :  { %v176_v32 = vmax.f32 %v172_v24, -128.0  ;;  %v160_v33 = vmul.f32 %v677_v6, %v159_v26  ;;  %v177_v39 = vmax.f32 %v173_v25, -128.0  ;;  %v369_v42 = vpack.c.bf16 %v323_v7, %v321_v38  ;;  %v494_v38 = vld [vmem:[#allocation12 + $0x78] sm:$0xff]  ;;  %v491_v7 = vld [vmem:[#allocation12 + $0x60] sm:$0xff] }
  0xad   :  { %402 = vmatpush.bf16.msra.mxu0 %v353_v23  ;;  %v492_v23 = vld [vmem:[#allocation12 + $0x68] sm:$0xff] }
  0xae   :  { %v161_v8 = vadd.f32 %v677_v6, %v160_v33  ;;  %v180_v41 = vmin.f32 %v176_v32, 127.0  ;;  %416 = vmatpush.bf16.msra.mxu1 %v369_v42  ;;  %v181_v54 = vmin.f32 %v177_v39, 127.0  ;;  %v496_v33 = vld [vmem:[#allocation12 + $0x88] sm:$0xff]  ;;  %v489_v42 = vld [vmem:[#allocation12 + $0x50] sm:$0xff] }
  0xaf   :  { %606 = vmatpush.msrb.mxu2 %v509_v44 }
  0xb0   :  { %v165_v48 = vsel %vm164_vm8, %v677_v6, %v161_v8  ;;  %v639_v57 = vceil.f32 %v180_v41  ;;  %v640_v37 = vfloor.f32 %v180_v41  ;;  %vm638_vm10 = vcmp.lt.s32.totalorder %v180_v41, 0 }
  0xb1   :  { %v170_v55 = vsel %vm167_vm9, %v169_v46, %v165_v48  ;;  %511 = vmatpush.msrb.mxu0 %v509_v44  ;;  %v644_v60 = vceil.f32 %v181_v54  ;;  %v645_v5 = vfloor.f32 %v181_v54  ;;  %v370_v6 = vpack.c.bf16 %v324_v61, %v322_v63  ;;  %607 = vmatpush.msrb.mxu2 %v507_v50  ;;  %v487_v48 = vld [vmem:[#allocation12 + $0x40] sm:$0xff] }
  0xb2   :  { %534 = vmatpush.msrb.mxu1 %v510_v45  ;;  %v174_v58 = vmul.f32 %v170_v55, %v912_v11  ;;  %v175_v59 = vmul.f32 %v170_v55, %v914_v12  ;;  %vm643_vm11 = vcmp.lt.s32.totalorder %v181_v54, 0  ;;  %v641_v13 = vsel %vm638_vm10, %v639_v57, %v640_v37  ;;  %v485_v54 = vld [vmem:[#allocation12 + $0x30] sm:$0xff]  ;;  %v486_v55 = vld [vmem:[#allocation12 + $0x38] sm:$0xff] }
  0xb3   :  { %512 = vmatpush.msrb.mxu0 %v507_v50  ;;  %444 = vmatpush.bf16.msra.mxu3 %v370_v6  ;;  %v646_v18 = vsel %vm643_vm11, %v644_v60, %v645_v5  ;;  %v642_v24 = vcvt.f32.s32 %v641_v13  ;;  %v481_v57 = vld [vmem:[#allocation12 + $0x10] sm:$0xff] }
  0xb4   :  { %535 = vmatpush.msrb.mxu1 %v508_v51  ;;  %v178_v1 = vmax.f32 %v174_v58, -128.0  ;;  %v179_v3 = vmax.f32 %v175_v59, -128.0  ;;  %608 = vmatpush.msrb.mxu2 %v505_v62  ;;  %v647_v27 = vcvt.f32.s32 %v646_v18  ;;  %v482_v58 = vld [vmem:[#allocation12 + $0x18] sm:$0xff]  ;;  %v479_v59 = vld [vmem:[#allocation12] sm:$0xff] }
  0xb5   :  { %513 = vmatpush.msrb.mxu0 %v505_v62  ;;  %v480_v62 = vld [vmem:[#allocation12 + $0x8] sm:$0xff] }
  0xb6   :  { %v182_v11 = vmin.f32 %v178_v1, 127.0  ;;  %v183_v12 = vmin.f32 %v179_v3, 127.0  ;;  %536 = vmatpush.msrb.mxu1 %v506_v0  ;;  %609 = vmatpush.msrb.mxu2 %v503_v4  ;;  %v477_v3 = vld [vmem:[#allocation10] sm:$0xff] }
  0xb7   :  { %514 = vmatpush.msrb.mxu0 %v503_v4  ;;  %622 = vmatpush.msrb.mxu3 %v510_v45  ;;  %v478_v4 = vld [vmem:[#allocation10 + $0x8] sm:$0xff] }
  0xb8   :  { %vm648_vm12 = vcmp.lt.s32.totalorder %v182_v11, 0  ;;  %v649_v14 = vceil.f32 %v182_v11  ;;  %v650_v15 = vfloor.f32 %v182_v11  ;;  %vm653_vm13 = vcmp.lt.s32.totalorder %v183_v12, 0  ;;  %537 = vmatpush.msrb.mxu1 %v504_v9  ;;  %610 = vmatpush.msrb.mxu2 %v501_v10 }
  0xb9   :  { %v654_v19 = vceil.f32 %v183_v12  ;;  %v655_v20 = vfloor.f32 %v183_v12  ;;  %515 = vmatpush.msrb.mxu0 %v501_v10  ;;  %623 = vmatpush.msrb.mxu3 %v508_v51  ;;  %v488_v51 = vld [vmem:[#allocation12 + $0x48] sm:$0xff] }
  0xba   :  { %v651_v2 = vsel %vm648_vm12, %v649_v14, %v650_v15  ;;  %538 = vmatpush.msrb.mxu1 %v502_v16  ;;  %611 = vmatpush.msrb.mxu2 %v499_v17  ;;  %v467_v15 = vld [vmem:[%s1004_s3] sm:$0x3]  ;;  %s841_s3 = smov [#allocation13]  }
  0xbb   :  { %v652_v25 = vcvt.f32.s32 %v651_v2  ;;  %v656_v26 = vsel %vm653_vm13, %v654_v19, %v655_v20  ;;  %516 = vmatpush.msrb.mxu0 %v499_v17  ;;  %624 = vmatpush.msrb.mxu3 %v506_v0  ;;  %v469_v18 = vperm.slane %v467_v15, 0  ;;  %v470_v19 = vperm.slane %v467_v15, 1  ;;  %v561_v20 = vld [vmem:[%s1007_s6] sm:$0x3]  ;;  %s579_s6 = sshll.u32 %s841_s3, 4  ;;  %s580_s6 = int_to_ptr.vmem [resolvable:$true] %s579_s6 }
  0xbc   :  { %v657_v28 = vcvt.f32.s32 %v656_v26  ;;  %539 = vmatpush.msrb.mxu1 %v500_v21  ;;  %612 = vmatpush.msrb.mxu2 %v497_v22 }
  0xbd   :  { %v188_v31 = vpack.c.b16 %v652_v25, %v642_v24  ;;  %517 = vmatpush.msrb.mxu0 %v497_v22  ;;  %625 = vmatpush.msrb.mxu3 %v504_v9  ;;  %v563_v25 = vperm.slane %v561_v20, 0 }
  0xbe   :  { %v190_v32 = vpack.c.b16 %v657_v28, %v647_v27  ;;  %540 = vmatpush.msrb.mxu1 %v498_v29  ;;  %613 = vmatpush.msrb.mxu2 %v495_v30  ;;  %v564_v27 = vperm.slane %v561_v20, 1 }
  0xbf   :  { %v189_v35 = vpack.c.b8 %v188_v31, %v188_v31  ;;  %518 = vmatpush.msrb.mxu0 %v495_v30  ;;  %626 = vmatpush.msrb.mxu3 %v502_v16 }
  0xc0   :  { %v191_v36 = vpack.c.b8 %v190_v32, %v190_v32  ;;  %541 = vmatpush.msrb.mxu1 %v496_v33  ;;  %614 = vmatpush.msrb.mxu2 %v493_v34 }
  0xc1   :  { %v192_v39 = vunpack.c.0.s8 %v189_v35  ;;  %v194_v8 = vunpack.c.1.s8 %v189_v35  ;;  %519 = vmatpush.msrb.mxu0 %v493_v34  ;;  %627 = vmatpush.msrb.mxu3 %v500_v21 }
  0xc2   :  { %v193_v40 = vunpack.c.0.s8 %v191_v36  ;;  %v195_v41 = vunpack.c.1.s8 %v191_v36  ;;  %542 = vmatpush.msrb.mxu1 %v494_v38  ;;  %615 = vmatpush.msrb.mxu2 %v491_v7 }
  0xc3   :  { %v196_v43 = vcvt.s32.f32 %v192_v39  ;;  %v198_v44 = vcvt.s32.f32 %v194_v8  ;;  %520 = vmatpush.msrb.mxu0 %v491_v7  ;;  %628 = vmatpush.msrb.mxu3 %v498_v29 }
  0xc4   :  { %v197_v45 = vcvt.s32.f32 %v193_v40  ;;  %v199_v46 = vcvt.s32.f32 %v195_v41  ;;  %543 = vmatpush.msrb.mxu1 %v492_v23  ;;  %616 = vmatpush.msrb.mxu2 %v489_v42 }
  0xc5   :  { %521 = vmatpush.msrb.mxu0 %v489_v42  ;;  %629 = vmatpush.msrb.mxu3 %v496_v33 }
  0xc6   :  { %v200_v49 = vpack.c.bf16 %v197_v45, %v196_v43  ;;  %v201_v50 = vpack.c.bf16 %v199_v46, %v198_v44  ;;  %544 = vmatpush.msrb.mxu1 %v490_v47  ;;  %617 = vmatpush.msrb.mxu2 %v487_v48 }
  0xc7   :  { %522 = vmatpush.msrb.mxu0 %v487_v48  ;;  %630 = vmatpush.msrb.mxu3 %v494_v38 }
  0xc8   :  { %202 = vst [vmem:[#allocation2] sm:$0xff] %v200_v49  ;;  %545 = vmatpush.msrb.mxu1 %v488_v51  ;;  %618 = vmatpush.msrb.mxu2 %v485_v54 }
  0xc9   :  { %203 = vst [vmem:[#allocation2 + $0x8] sm:$0xff] %v201_v50  ;;  %523 = vmatpush.msrb.mxu0 %v485_v54  ;;  %631 = vmatpush.msrb.mxu3 %v492_v23 }
  0xca   :  { %546 = vmatpush.msrb.mxu1 %v486_v55  ;;  %619 = vmatpush.msrb.mxu2 %v483_v56 }
  0xcb   :  { %524 = vmatpush.msrb.mxu0 %v483_v56  ;;  %632 = vmatpush.msrb.mxu3 %v490_v47 }
  0xcc   :  { %547 = vmatpush.msrb.mxu1 %v484_v52  ;;  %620 = vmatpush.msrb.mxu2 %v481_v57 }
  0xcd   :  { %525 = vmatpush.msrb.mxu0 %v481_v57  ;;  %633 = vmatpush.msrb.mxu3 %v488_v51 }
  0xce   :  { %548 = vmatpush.msrb.mxu1 %v482_v58  ;;  %621 = vmatpush.msrb.mxu2 %v479_v59 }
  0xcf   :  { %v598_v37 = vld [vmem:[#allocation2] sm:$0xf]  ;;  %v604_v53 = vld [vmem:[#allocation2 + $0x4] sm:$0xf]  ;;  %526 = vmatpush.msrb.mxu0 %v479_v59  ;;  %634 = vmatpush.msrb.mxu3 %v486_v55 }
  0xd0   :  { %v605_v63 = vld [vmem:[#allocation2 + $0x4] sm:$0xf0]  ;;  %v600_v61 = vld [vmem:[#allocation2 + $0x8] sm:$0xf0]  ;;  %549 = vmatpush.msrb.mxu1 %v480_v62 }
  0xd1   :  { %v599_v0 = vor.u32 %v605_v63, %v598_v37  ;;  %v603_v1 = vor.u32 %v604_v53, %v600_v61  ;;  %635 = vmatpush.msrb.mxu3 %v484_v52 }
  0xd3   :  { %403 = vmatmul.bf16.vlgmr.msra.gmra.mxu0 %v599_v0  ;;  %417 = vmatmul.bf16.vlgmr.msra.gmra.mxu1 %v603_v1 }
  0xd4   :  { %431 = vmatmul.bf16.vlgmr.msra.gmra.mxu2 %v599_v0  ;;  %445 = vmatmul.bf16.vlgmr.msra.gmra.mxu3 %v603_v1 }
  0xd5   :  { %636 = vmatpush.msrb.mxu3 %v482_v58 }
  0xd7   :  { %637 = vmatpush.msrb.mxu3 %v480_v62 }
  0xe3   :  { %527 = vmatmul.f32.vlgmr.msrb.gmra.mxu0 %v477_v3  ;;  %550 = vmatmul.f32.vlgmr.msrb.gmra.mxu1 %v477_v3 }
  0xe4   :  { %530 = vmatmul.f32.vlgmr.msrb.gmra.mxu2 %v478_v4  ;;  %553 = vmatmul.f32.vlgmr.msrb.gmra.mxu3 %v478_v4 }
 0x113   :  { %v456_v6 = vpop.permute.xlu1 %455 }
 0x11b   :  { %v461_v31 = vpop.permute.xlu1 %460 }
 0x150   :  { %v404_v60 = vpop.f32.mrf.mxu0  ;;  %v418_v5 = vpop.f32.mrf.mxu1 }
 0x151   :  { %v419_v11 = vadd.f32 %v418_v5, %v404_v60 }
 0x153   :  { %v463_v16 = vmul.f32 %v456_v6, %v419_v11 }
 0x155   :  { %v473_v24 = vmul.f32 %v469_v18, %v463_v16 }
 0x157   :  { %v432_v12 = vpop.f32.mrf.mxu2  ;;  %v446_v9 = vpop.f32.mrf.mxu3 }
 0x158   :  { %v447_v10 = vadd.f32 %v446_v9, %v432_v12  ;;  %v406_v13 = vpop.f32.mrf.mxu0  ;;  %v420_v14 = vpop.f32.mrf.mxu1 }
 0x159   :  { %v421_v2 = vadd.f32 %v420_v14, %v406_v13 }
 0x15a   :  { %v464_v17 = vmul.f32 %v456_v6, %v447_v10 }
 0x15b   :  { %v465_v34 = vmul.f32 %v461_v31, %v421_v2 }
 0x15c   :  { %v474_v26 = vmul.f32 %v470_v19, %v464_v17 }
 0x15d   :  { %v475_v7 = vmul.f32 %v469_v18, %v465_v34 }
 0x15f   :  { %v434_v21 = vpop.f32.mrf.mxu2  ;;  %v448_v22 = vpop.f32.mrf.mxu3 }
 0x160   :  { %v449_v28 = vadd.f32 %v448_v22, %v434_v21  ;;  %v528_v29 = vpop.f32.mrf.mxu0  ;;  %v551_v30 = vpop.f32.mrf.mxu1 }
 0x161   :  { %v557_v32 = vadd.f32 %v528_v29, %v473_v24  ;;  %v558_v33 = vadd.f32 %v551_v30, %v474_v26 }
 0x162   :  { %v466_v35 = vmul.f32 %v461_v31, %v449_v28 }
 0x163   :  { %v567_v36 = vadd.f32 %v563_v25, %v557_v32  ;;  %v568_v38 = vadd.f32 %v564_v27, %v558_v33 }
 0x164   :  { %v476_v39 = vmul.f32 %v470_v19, %v466_v35 }
 0x165   :  { %571 = vst [vmem:[#allocation13] sm:$0xff] %v567_v36 }
 0x166   :  { %572 = vst [vmem:[#allocation13 + $0x8] sm:$0xff] %v568_v38 }
 0x167   :  { %v531_v8 = vpop.f32.mrf.mxu2  ;;  %v554_v40 = vpop.f32.mrf.mxu3 }
 0x168   :  { %v559_v41 = vadd.f32 %v531_v8, %v475_v7  ;;  %v560_v23 = vadd.f32 %v554_v40, %v476_v39 }
 0x16a   :  { %v569_v42 = vadd.f32 %v563_v25, %v559_v41  ;;  %v570_v43 = vadd.f32 %v564_v27, %v560_v23 }
 0x16c   :  { %573 = vst [vmem:[#allocation13 + $0x10] sm:$0xff] %v569_v42 }
 0x16d   :  { %574 = vst [vmem:[#allocation13 + $0x18] sm:$0xff] %v570_v43 }
 0x16e   :  { %587 = dma.vmem_to_hbm [thread:$0]  %s580_s6, 512, %s582_s8, [#allocation6], %s835_s19, %s835_s19, %s836_s20  }
 0x16f   :  { %828 = dma.done.wait [#allocation6], 512  }
 0x170   :  { %829 = vsyncadd [#allocation6], 4294966784 }
 0x171   :  { %592 = vsyncpa [#allocation5], 1 }
 0x172   :  { %593 = vsyncpa [#allocation8], 1 }
 0x173   :  { %594 = vsyncpa [#allocation11], 1 }
 0x174   :  { %595 = vsyncpa [#allocation6], 1 }

</bundles_post_ra>
